<compile_context>
chip_gen: v7x
topology: tpu7x:2x2x1
jax: 0.10.0
libtpu: 0.0.40
codegen_flags: <defaults>
</compile_context>

<pallas_src>
import math

import jax
import jax.numpy as jnp
from jax.experimental import pallas as pl
from jax.experimental.pallas import tpu as pltpu


def _gelu_tanh(h):
    # Exact PyTorch nn.GELU(approximate='tanh') semantics (f32 math).
    c = math.sqrt(2.0 / math.pi)
    return 0.5 * h * (1.0 + jnp.tanh(c * (h + 0.044715 * h * h * h)))


def mlp_kernel(x_ref, wfc_ref, bfc_ref, wproj_ref, bproj_ref, o_ref, acc_ref):
    # x_ref:     (tm, D)
    # wfc_ref:   (D, tn)    bfc_ref:   (1, tn)
    # wproj_ref: (tn, D)    bproj_ref: (1, D)
    # o_ref:     (tm, D)    acc_ref:   (tm, D) f32 scratch (resident over j)
    j = pl.program_id(1)
    nj = pl.num_programs(1)
    is_first = j == 0
    is_last = j == nj - 1

    # c_fc chunk: native-dtype operands on the MXU, f32 accumulation.
    h = jnp.dot(x_ref[...], wfc_ref[...], preferred_element_type=jnp.float32)
    h = h + bfc_ref[...].astype(jnp.float32)

    # GELU (tanh approx) in f32 for accuracy; cast back for the second matmul.
    g = _gelu_tanh(h).astype(wproj_ref.dtype)

    # c_proj chunk: (tm, tn) @ (tn, D) partial sum in f32.
    partial = jnp.dot(g, wproj_ref[...], preferred_element_type=jnp.float32)

    bproj_f32 = bproj_ref[...].astype(jnp.float32)

    # Single reduction step: write output directly, never touch acc.
    @pl.when(jnp.logical_and(is_first, is_last))
    def _only():
        o_ref[...] = (partial + bproj_f32).astype(o_ref.dtype)

    # First of several steps: store (no zero-init + += round trip).
    @pl.when(jnp.logical_and(is_first, jnp.logical_not(is_last)))
    def _first():
        acc_ref[...] = partial

    # Middle steps: accumulate.
    @pl.when(jnp.logical_and(jnp.logical_not(is_first), jnp.logical_not(is_last)))
    def _mid():
        acc_ref[...] += partial

    # Last of several steps: fuse final add + bias + cast (no RMW into acc).
    @pl.when(jnp.logical_and(jnp.logical_not(is_first), is_last))
    def _last():
        o_ref[...] = (acc_ref[...] + partial + bproj_f32).astype(o_ref.dtype)


# ---------------------------------------------------------------------------
# Tile / VMEM selection helpers
# ---------------------------------------------------------------------------

def _round_up(v, m):
    return ((v + m - 1) // m) * m


def _vmem_capacity_bytes():
    # Generation-aware physical VMEM; conservative fallback (v7x = 64 MiB/TC).
    try:
        cap = int(pltpu.get_tpu_info().vmem_capacity_bytes)
        if cap > 0:
            return cap
    except Exception:
        pass
    return 64 * 1024 * 1024


def _vmem_estimate(tm, tn, D, itemsize):
    # Double-buffered streamed tiles + f32 accumulator + live intermediates.
    stream = 2 * (tm * D            # x tile
                  + D * tn + tn     # W_fc chunk + b_fc chunk
                  + tn * D + D      # W_proj chunk + b_proj
                  + tm * D          # out tile
                  ) * itemsize
    acc = tm * D * 4
    live = tm * tn * (4 + itemsize)  # h (f32) + g (compute dtype)
    return stream + acc + live


def _tn_candidates(H, tn_cap):
    """Divisors of H <= tn_cap that are multiples of 128 (best) or any divisor."""
    hi = min(tn_cap, H)
    cands = [d for d in range(hi, 0, -1) if H % d == 0 and d % 128 == 0]
    if not cands:
        cands = [d for d in range(hi, 0, -1) if H % d == 0]
    return cands


def _select_tiles(M, D, H, itemsize, vmem_cap):
    budget = int(vmem_cap * 0.75)        # headroom for compiler internal scratch
    sub = max(8, 32 // itemsize)         # sublane multiple: 8 f32 / 16 bf16 / 32 i8

    big_vmem = vmem_cap >= (96 << 20)    # v5e / v6e (128 MiB) vs v7x (64 MiB)
    tm_target = 1024 if big_vmem else 512
    tn_target = 1024 if big_vmem else 512

    tm = min(tm_target, _round_up(M, sub))
    # Guarantee >=2 row tiles for medium/large M so the "parallel" axis can
    # shard across the two v7x TensorCores (no-op on 1-TC v5e/v6e small cases).
    if M >= 256 and pl.cdiv(M, tm) < 2:
        tm = _round_up(pl.cdiv(M, 2), sub)

    tn_list = _tn_candidates(H, tn_target)
    tn = tn_list[0]

    # Shrink to fit VMEM: prefer shrinking tn (keeps AI high), then halve tm.
    while _vmem_estimate(tm, tn, D, itemsize) > budget:
        smaller = [d for d in tn_list if d < tn]
        if smaller and tn > 128:
            tn = smaller[0]
        elif tm > sub:
            tm = max(sub, _round_up(tm // 2, sub))
        else:
            break
    return tm, tn


# ---------------------------------------------------------------------------
# Wrapper
# ---------------------------------------------------------------------------

def mlp_forward(x, w_fc, b_fc, w_proj, b_proj, *, compute_dtype=None):
    """x: (M, D); w_fc: (D, H); b_fc: (H,); w_proj: (H, D); b_proj: (D,).

    compute_dtype: optional dtype to feed the MXU with (e.g. jnp.bfloat16 for
    f32 models); accumulation and GELU stay in f32, output keeps x.dtype.
    """
    M, D = x.shape
    H = w_fc.shape[1]
    out_dtype = x.dtype

    cdtype = jnp.dtype(compute_dtype) if compute_dtype is not None else jnp.dtype(x.dtype)
    itemsize = cdtype.itemsize
    if cdtype != x.dtype:
        x = x.astype(cdtype)
        w_fc = w_fc.astype(cdtype)
        w_proj = w_proj.astype(cdtype)

    vmem_cap = _vmem_capacity_bytes()
    tm, tn = _select_tiles(M, D, H, itemsize, vmem_cap)

    # Pad rows so the grid covers M exactly (rows are independent; padded rows
    # produce garbage that is sliced off afterwards).
    M_pad = pl.cdiv(M, tm) * tm
    x_in = x if M_pad == M else jnp.pad(x, ((0, M_pad - M), (0, 0)))

    b_fc2 = b_fc.reshape(1, H)
    b_proj2 = b_proj.reshape(1, D)

    grid = (M_pad // tm, H // tn)
    n_row_tiles = grid[0]

    est_vmem = _vmem_estimate(tm, tn, D, itemsize)
    vmem_limit = int(min(max(int(est_vmem * 1.5), 32 * 1024 * 1024),
                         int(vmem_cap * 0.85)))

    # Truthful HBM traffic: weights are re-streamed once per row tile.
    cost = pl.CostEstimate(
        flops=int(2 * 2 * M_pad * D * H),           # two matmuls
        transcendentals=int(M_pad * H),             # tanh inside GELU
        bytes_accessed=int((2 * M_pad * D + D) * itemsize
                           + n_row_tiles * (2 * D * H + H) * itemsize),
    )

    # TODO(synk): if weight-chunk DMA is still exposed on v6e, add
    # pipeline_mode=pl.Buffered(3) on the two weight BlockSpecs only.
    out = pl.pallas_call(
        mlp_kernel,
        out_shape=jax.ShapeDtypeStruct((M_pad, D), out_dtype),
        grid_spec=pltpu.PrefetchScalarGridSpec(
            num_scalar_prefetch=0,
            grid=grid,
            in_specs=[
                pl.BlockSpec((tm, D), lambda i, j: (i, 0)),   # x row tile
                pl.BlockSpec((D, tn), lambda i, j: (0, j)),   # W_fc col chunk
                pl.BlockSpec((1, tn), lambda i, j: (0, j)),   # b_fc chunk
                pl.BlockSpec((tn, D), lambda i, j: (j, 0)),   # W_proj row chunk
                pl.BlockSpec((1, D), lambda i, j: (0, 0)),    # b_proj
            ],
            out_specs=pl.BlockSpec((tm, D), lambda i, j: (i, 0)),
            scratch_shapes=[pltpu.VMEM((tm, D), jnp.float32)],
        ),
        compiler_params=pltpu.CompilerParams(
            dimension_semantics=("parallel", "arbitrary"),
            vmem_limit_bytes=vmem_limit,
        ),
        cost_estimate=cost,
    )(x_in, w_fc, b_fc2, w_proj, b_proj2)

    return out if M_pad == M else out[:M]


def mlp_reference(x, w_fc, b_fc, w_proj, b_proj):
    h = x.astype(jnp.float32) @ w_fc.astype(jnp.float32) + b_fc
    g = _gelu_tanh(h)
    return (g @ w_proj.astype(jnp.float32) + b_proj).astype(x.dtype)


if __name__ == "__main__":
    # Small config consistent with the module: n_embd=32, batch=2, seq=8.
    n_embd = 32
    hidden = 4 * n_embd          # 128
    batch, seq = 2, 8
    M = batch * seq              # 16 rows

    key = jax.random.PRNGKey(0)
    kx, kw1, kb1, kw2, kb2 = jax.random.split(key, 5)

    x = jax.random.normal(kx, (batch, seq, n_embd), dtype=jnp.float32)
    # Deterministic synthetic params, stored as (in, out) = PyTorch W^T.
    w_fc = jax.random.normal(kw1, (n_embd, hidden), dtype=jnp.float32) * 0.02
    b_fc = jax.random.normal(kb1, (hidden,), dtype=jnp.float32) * 0.02
    w_proj = jax.random.normal(kw2, (hidden, n_embd), dtype=jnp.float32) * 0.02
    b_proj = jax.random.normal(kb2, (n_embd,), dtype=jnp.float32) * 0.02

    x2d = x.reshape(M, n_embd)
    ref = mlp_reference(x2d, w_fc, b_fc, w_proj, b_proj).reshape(batch, seq, n_embd)

    # f32 path: tight check against the f32 reference.
    out = mlp_forward(x2d, w_fc, b_fc, w_proj, b_proj)
    out = jax.block_until_ready(out).reshape(batch, seq, n_embd)
    assert out.shape == (batch, seq, n_embd)
    assert jnp.allclose(out, ref, atol=1e-5, rtol=1e-5), "f32 mismatch vs reference"

    # bf16-MXU-feed path (production config): loose tolerance vs f32 reference.
    out_bf = mlp_forward(x2d, w_fc, b_fc, w_proj, b_proj,
                         compute_dtype=jnp.bfloat16)
    out_bf = jax.block_until_ready(out_bf).reshape(batch, seq, n_embd)
    assert jnp.allclose(out_bf, ref, atol=1e-2, rtol=5e-2), "bf16 mismatch vs reference"

    print("KERNEL_OK")
</pallas_src>

<mosaic_0001>
module attributes {stable_mosaic.version = 11 : i64} {
  func.func @mlp_kernel(%arg0: i32, %arg1: i32, %arg2: memref<16x32xf32, #tpu.memory_space<vmem>>, %arg3: memref<32x128xf32, #tpu.memory_space<vmem>>, %arg4: memref<1x128xf32, #tpu.memory_space<vmem>>, %arg5: memref<128x32xf32, #tpu.memory_space<vmem>>, %arg6: memref<1x32xf32, #tpu.memory_space<vmem>>, %arg7: memref<16x32xf32, #tpu.memory_space<vmem>>, %arg8: memref<16x32xf32, #tpu.memory_space<vmem>>) attributes {dimension_semantics = [#tpu.dimension_semantics<parallel>, #tpu.dimension_semantics<arbitrary>], iteration_bounds = array<i64: 1, 1>, scalar_prefetch = 0 : i64, scratch_operands = 1 : i64, tpu.core_type = #tpu.core_type<tc>, window_params = [{transform_indices = @transform_0, window_bounds = array<i64: 16, 32>}, {transform_indices = @transform_1, window_bounds = array<i64: 32, 128>}, {transform_indices = @transform_2, window_bounds = array<i64: 1, 128>}, {transform_indices = @transform_3, window_bounds = array<i64: 128, 32>}, {pipeline_mode = #tpu.pipeline_mode<synchronous>, transform_indices = @transform_4, window_bounds = array<i64: 1, 32>}, {transform_indices = @transform_5, window_bounds = array<i64: 16, 32>}]} {
    %c0_i32 = arith.constant 0 : i32
    %0 = arith.cmpi eq, %arg1, %c0_i32 : i32
    %c0_i32_0 = arith.constant 0 : i32
    %1 = arith.cmpi eq, %arg1, %c0_i32_0 : i32
    %c0 = arith.constant 0 : index
    %c0_1 = arith.constant 0 : index
    %2 = vector.load %arg2[%c0, %c0_1] : memref<16x32xf32, #tpu.memory_space<vmem>>, vector<16x32xf32>
    %c0_2 = arith.constant 0 : index
    %c0_3 = arith.constant 0 : index
    %3 = vector.load %arg3[%c0_2, %c0_3] : memref<32x128xf32, #tpu.memory_space<vmem>>, vector<32x128xf32>
    %cst = arith.constant dense<0.000000e+00> : vector<16x128xf32>
    %4 = tpu.matmul %2, %3, %cst {dimension_numbers = #tpu.dot_dimension_numbers<[1], [0], [0], [1], [0, 0, 1, 1], [], []>} : vector<16x32xf32>, vector<32x128xf32>, vector<16x128xf32> -> vector<16x128xf32>
    %c0_4 = arith.constant 0 : index
    %c0_5 = arith.constant 0 : index
    %5 = vector.load %arg4[%c0_4, %c0_5] : memref<1x128xf32, #tpu.memory_space<vmem>>, vector<1x128xf32>
    %6 = vector.broadcast %5 : vector<1x128xf32> to vector<16x128xf32>
    %7 = arith.addf %4, %6 : vector<16x128xf32>
    %cst_6 = arith.constant 5.000000e-01 : f32
    %8 = vector.broadcast %cst_6 : f32 to vector<16x128xf32>
    %9 = arith.mulf %8, %7 : vector<16x128xf32>
    %cst_7 = arith.constant 4.471500e-02 : f32
    %10 = vector.broadcast %cst_7 : f32 to vector<16x128xf32>
    %11 = arith.mulf %10, %7 : vector<16x128xf32>
    %12 = arith.mulf %11, %7 : vector<16x128xf32>
    %13 = arith.mulf %12, %7 : vector<16x128xf32>
    %14 = arith.addf %7, %13 : vector<16x128xf32>
    %cst_8 = arith.constant 0.797884583 : f32
    %15 = vector.broadcast %cst_8 : f32 to vector<16x128xf32>
    %16 = arith.mulf %15, %14 : vector<16x128xf32>
    %17 = math.tanh %16 : vector<16x128xf32>
    %cst_9 = arith.constant 1.000000e+00 : f32
    %18 = vector.broadcast %cst_9 : f32 to vector<16x128xf32>
    %19 = arith.addf %18, %17 : vector<16x128xf32>
    %20 = arith.mulf %9, %19 : vector<16x128xf32>
    %c0_10 = arith.constant 0 : index
    %c0_11 = arith.constant 0 : index
    %21 = vector.load %arg5[%c0_10, %c0_11] : memref<128x32xf32, #tpu.memory_space<vmem>>, vector<128x32xf32>
    %cst_12 = arith.constant dense<0.000000e+00> : vector<16x32xf32>
    %22 = tpu.matmul %20, %21, %cst_12 {dimension_numbers = #tpu.dot_dimension_numbers<[1], [0], [0], [1], [0, 0, 1, 1], [], []>} : vector<16x128xf32>, vector<128x32xf32>, vector<16x32xf32> -> vector<16x32xf32>
    %c0_13 = arith.constant 0 : index
    %c0_14 = arith.constant 0 : index
    %23 = vector.load %arg6[%c0_13, %c0_14] : memref<1x32xf32, #tpu.memory_space<vmem>>, vector<1x32xf32>
    %24 = arith.andi %0, %1 : i1
    %25 = arith.extui %24 : i1 to i32
    %c0_i32_15 = arith.constant 0 : i32
    %26 = arith.cmpi ne, %25, %c0_i32_15 : i32
    scf.if %26 {
      %40 = vector.broadcast %23 : vector<1x32xf32> to vector<16x32xf32>
      %41 = arith.addf %22, %40 : vector<16x32xf32>
      %c0_22 = arith.constant 0 : index
      %c0_23 = arith.constant 0 : index
      %42 = vector.load %arg7[%c0_22, %c0_23] : memref<16x32xf32, #tpu.memory_space<vmem>>, vector<16x32xf32>
      tpu.vector_store %arg7[%c0_22, %c0_23], %41 {strides = array<i32>} : memref<16x32xf32, #tpu.memory_space<vmem>>, vector<16x32xf32>,
    } else {
    }
    %true = arith.constant true
    %27 = arith.xori %1, %true : i1
    %28 = arith.andi %0, %27 : i1
    %29 = arith.extui %28 : i1 to i32
    %c0_i32_16 = arith.constant 0 : i32
    %30 = arith.cmpi ne, %29, %c0_i32_16 : i32
    scf.if %30 {
      %c0_22 = arith.constant 0 : index
      %c0_23 = arith.constant 0 : index
      %40 = vector.load %arg8[%c0_22, %c0_23] : memref<16x32xf32, #tpu.memory_space<vmem>>, vector<16x32xf32>
      tpu.vector_store %arg8[%c0_22, %c0_23], %22 {strides = array<i32>} : memref<16x32xf32, #tpu.memory_space<vmem>>, vector<16x32xf32>,
    } else {
    }
    %true_17 = arith.constant true
    %31 = arith.xori %0, %true_17 : i1
    %true_18 = arith.constant true
    %32 = arith.xori %1, %true_18 : i1
    %33 = arith.andi %31, %32 : i1
    %34 = arith.extui %33 : i1 to i32
    %c0_i32_19 = arith.constant 0 : i32
    %35 = arith.cmpi ne, %34, %c0_i32_19 : i32
    scf.if %35 {
      %c0_22 = arith.constant 0 : index
      %c0_23 = arith.constant 0 : index
      %40 = vector.load %arg8[%c0_22, %c0_23] : memref<16x32xf32, #tpu.memory_space<vmem>>, vector<16x32xf32>
      %41 = arith.addf %40, %22 : vector<16x32xf32>
      %c0_24 = arith.constant 0 : index
      %c0_25 = arith.constant 0 : index
      %42 = vector.load %arg8[%c0_24, %c0_25] : memref<16x32xf32, #tpu.memory_space<vmem>>, vector<16x32xf32>
      tpu.vector_store %arg8[%c0_24, %c0_25], %41 {strides = array<i32>} : memref<16x32xf32, #tpu.memory_space<vmem>>, vector<16x32xf32>,
    } else {
    }
    %true_20 = arith.constant true
    %36 = arith.xori %0, %true_20 : i1
    %37 = arith.andi %36, %1 : i1
    %38 = arith.extui %37 : i1 to i32
    %c0_i32_21 = arith.constant 0 : i32
    %39 = arith.cmpi ne, %38, %c0_i32_21 : i32
    scf.if %39 {
      %c0_22 = arith.constant 0 : index
      %c0_23 = arith.constant 0 : index
      %40 = vector.load %arg8[%c0_22, %c0_23] : memref<16x32xf32, #tpu.memory_space<vmem>>, vector<16x32xf32>
      %41 = arith.addf %40, %22 : vector<16x32xf32>
      %42 = vector.broadcast %23 : vector<1x32xf32> to vector<16x32xf32>
      %43 = arith.addf %41, %42 : vector<16x32xf32>
      %c0_24 = arith.constant 0 : index
      %c0_25 = arith.constant 0 : index
      %44 = vector.load %arg7[%c0_24, %c0_25] : memref<16x32xf32, #tpu.memory_space<vmem>>, vector<16x32xf32>
      tpu.vector_store %arg7[%c0_24, %c0_25], %43 {strides = array<i32>} : memref<16x32xf32, #tpu.memory_space<vmem>>, vector<16x32xf32>,
    } else {
    }
    return
  }
  func.func @transform_0(%arg0: i32, %arg1: i32) -> (i32, i32) {
    %c0_i32 = arith.constant 0 : i32
    %c0_i32_0 = arith.constant 0 : i32
    return %arg0, %c0_i32 : i32, i32
  }
  func.func @transform_1(%arg0: i32, %arg1: i32) -> (i32, i32) {
    %c0_i32 = arith.constant 0 : i32
    %c0_i32_0 = arith.constant 0 : i32
    return %c0_i32, %arg1 : i32, i32
  }
  func.func @transform_2(%arg0: i32, %arg1: i32) -> (i32, i32) {
    %c0_i32 = arith.constant 0 : i32
    %c0_i32_0 = arith.constant 0 : i32
    return %c0_i32, %arg1 : i32, i32
  }
  func.func @transform_3(%arg0: i32, %arg1: i32) -> (i32, i32) {
    %c0_i32 = arith.constant 0 : i32
    %c0_i32_0 = arith.constant 0 : i32
    return %arg1, %c0_i32 : i32, i32
  }
  func.func @transform_4(%arg0: i32, %arg1: i32) -> (i32, i32) {
    %c0_i32 = arith.constant 0 : i32
    %c0_i32_0 = arith.constant 0 : i32
    %c0_i32_1 = arith.constant 0 : i32
    return %c0_i32, %c0_i32_0 : i32, i32
  }
  func.func @transform_5(%arg0: i32, %arg1: i32) -> (i32, i32) {
    %c0_i32 = arith.constant 0 : i32
    %c0_i32_0 = arith.constant 0 : i32
    return %arg0, %c0_i32 : i32, i32
  }
}

</mosaic_0001>

<bundles_post_ra>
// kernel: tpu_custom_call.1
= control target key start
LH: loop header
LB: loop body
LE: loop exit
PB: predicated region body
PF: predicated region fallthrough
CT: control target
= control target key end

     0   :  { %vm35_vm0 = vcmask 261120   ;;  %s554_s0 = inlined_call_operand.vmem [shape: f32[16,32], index: 0, kind: input, shape index: {}]   ;;  %s555_s1 = inlined_call_operand.vmem [shape: f32[32,128], index: 1, kind: input, shape index: {}]   ;;  %s556_s2 = inlined_call_operand.vmem [shape: f32[1,128], index: 2, kind: input, shape index: {}]   ;;  %s557_s3 = inlined_call_operand.vmem [shape: f32[128,32], index: 3, kind: input, shape index: {}]   ;;  %s558_s4 = inlined_call_operand.vmem [shape: f32[1,32], index: 4, kind: input, shape index: {}]   ;;  %s559_s5 = inlined_call_operand.hbm [shape: f32[16,32], index: 5, kind: output, shape index: {}]  }
   0x1   :  { %v24_v0 = vld [vmem:[%s555_s1] sm:$0xff]  ;;  %v25_v1 = vld [vmem:[%s555_s1 + $0x8] sm:$0xff]  ;;  %v26_v2 = vld [vmem:[%s555_s1 + $0x10] sm:$0xff] }
   0x2   :  { %v362_v3 = vpack.c.bf16 %v25_v1, %v24_v0  ;;  %v27_v4 = vld [vmem:[%s555_s1 + $0x18] sm:$0xff]  ;;  %v22_v5 = vld [vmem:[%s554_s0] sm:$0xff]  ;;  %v136_v8 = vld [vmem:[%s557_s3 + $0x8] sm:$0xff] }
   0x3   :  { %v366_v6 = vpack.c.bf16 %v27_v4, %v26_v2  ;;  %324 = vmatprep.mubr.msk.f32.mxu0 %vm35_vm0, %v22_v5  ;;  %v135_v7 = vld [vmem:[%s557_s3] sm:$0xff] }
   0x4   :  { %10 = vsyncpa [#allocation4], 0  ;;  %363 = vmatprep.subr.bf16.mxu0 %v362_v3  ;;  %v370_v9 = vpack.c.bf16 %v136_v8, %v135_v7  ;;  %v23_v10 = vld [vmem:[%s554_s0 + $0x8] sm:$0xff]  ;;  %v137_v11 = vld [vmem:[%s557_s3 + $0x10] sm:$0xff]  ;;  %s433_s11 = smov [#allocation3]  }
   0x5   :  { %365 = vmatpush3.bf16.msra.mxu0 %v362_v3  ;;  %v138_v12 = vld [vmem:[%s557_s3 + $0x18] sm:$0xff]  ;;  %v139_v14 = vld [vmem:[%s557_s3 + $0x20] sm:$0xff]  ;;  %v140_v15 = vld [vmem:[%s557_s3 + $0x28] sm:$0xff]  ;;  %s277_s12 = sshll.u32 %s433_s11, 4  ;;  %s278_s12 = int_to_ptr.vmem [resolvable:$true] %s277_s12 }
   0x6   :  { %367 = vmatprep.subr.bf16.mxu0 %v366_v6  ;;  %371 = vmatprep.subr.bf16.mxu1 %v370_v9  ;;  %v374_v13 = vpack.c.bf16 %v138_v12, %v137_v11  ;;  %v378_v16 = vpack.c.bf16 %v140_v15, %v139_v14  ;;  %v141_v17 = vld [vmem:[%s557_s3 + $0x30] sm:$0xff]  ;;  %v142_v18 = vld [vmem:[%s557_s3 + $0x38] sm:$0xff]  ;;  %v143_v19 = vld [vmem:[%s557_s3 + $0x40] sm:$0xff]  ;;  %s409_s13 = scalar_lea.vmem %s278_s12, 256  ;;  %p414_p1 = scmp.lt.s32.totalorder %s278_s12, %s278_s12 }
   0x7   :  { %373 = vmatpush3.bf16.msra.mxu1 %v370_v9  ;;  %v382_v20 = vpack.c.bf16 %v142_v18, %v141_v17  ;;  %v144_v21 = vld [vmem:[%s557_s3 + $0x48] sm:$0xff]  ;;  %v145_v23 = vld [vmem:[%s557_s3 + $0x50] sm:$0xff]  ;;  %v146_v24 = vld [vmem:[%s557_s3 + $0x58] sm:$0xff]  ;;  %p410_p0 = scmp.ne.s32.totalorder %s278_s12, %s409_s13  ;;  %p415_p2 = scmp.lt.s32.totalorder %s409_s13, %s409_s13 }
   0x8   :  { %375 = vmatprep.subr.bf16.mxu1 %v374_v13  ;;  %v386_v22 = vpack.c.bf16 %v144_v21, %v143_v19  ;;  %v390_v25 = vpack.c.bf16 %v146_v24, %v145_v23  ;;  %v147_v26 = vld [vmem:[%s557_s3 + $0x60] sm:$0xff]  ;;  %v148_v27 = vld [vmem:[%s557_s3 + $0x68] sm:$0xff]  ;;  %v149_v29 = vld [vmem:[%s557_s3 + $0x70] sm:$0xff] }
   0x9   :  { %369 = vmatpush3.bf16.msra.mxu0 %v366_v6  ;;  %v394_v28 = vpack.c.bf16 %v148_v27, %v147_v26  ;;  %v150_v30 = vld [vmem:[%s557_s3 + $0x78] sm:$0xff]  ;;  %v288_v32 = vld [vmem:[%s556_s2] ss:$0 sm:$0xff]  ;;  %p416_p3 = por %p415_p2, %p414_p1 }
   0xa   :  { %v398_v31 = vpack.c.bf16 %v150_v30, %v149_v29  ;;  %v291_v55 = vld [vmem:[%s558_s4] ss:$0 sm:$0xff] }
   0xb   :  { %377 = vmatpush3.bf16.msra.mxu1 %v374_v13  ;;  %p417_p4 = pnand %p416_p3, %p410_p0 }
   0xc   :  { %325 = vmatmul.mubr.msk.f32.vlgmr.msra.gmra.mrb[0].mxu0 %vm35_vm0, %v23_v10  ;;  %379 = vmatprep.subr.bf16.mxu1 %v378_v16 }
   0xf   :  { %381 = vmatpush3.bf16.msra.mxu1 %v378_v16 }
  0x10   :  { %383 = vmatprep.subr.bf16.mxu1 %v382_v20 }
  0x13   :  { %385 = vmatpush3.bf16.msra.mxu1 %v382_v20 }
  0x14   :  { %387 = vmatprep.subr.bf16.mxu1 %v386_v22 }
  0x17   :  { %389 = vmatpush3.bf16.msra.mxu1 %v386_v22 }
  0x18   :  { %391 = vmatprep.subr.bf16.mxu1 %v390_v25 }
  0x1b   :  { %393 = vmatpush3.bf16.msra.mxu1 %v390_v25 }
  0x1c   :  { %395 = vmatprep.subr.bf16.mxu1 %v394_v28 }
  0x1f   :  { %397 = vmatpush3.bf16.msra.mxu1 %v394_v28 }
  0x20   :  { %399 = vmatprep.subr.bf16.mxu1 %v398_v31 }
  0x23   :  { %401 = vmatpush3.bf16.msra.mxu1 %v398_v31 }
  0xdf   :  { %v326_v33 = vpop.f32.mrb[0].mxu0 }
  0xe0   :  { %v114_v34 = vadd.f32 %v326_v33, %v288_v32  ;;  %v108_v35 = vpop.f32.mrb[1].mxu0 }
  0xe1   :  { %v109_v36 = vadd.f32 %v288_v32, %v108_v35 }
  0xe2   :  { %v120_v37 = vmul.f32 0.044715, %v114_v34  ;;  %v118_v52 = vmul.f32 0.5, %v114_v34 }
  0xe3   :  { %v119_v38 = vmul.f32 0.044715, %v109_v36  ;;  %v117_v50 = vmul.f32 0.5, %v109_v36 }
  0xe4   :  { %v122_v39 = vmul.f32 %v120_v37, %v114_v34 }
  0xe5   :  { %v121_v40 = vmul.f32 %v119_v38, %v109_v36 }
  0xe6   :  { %v124_v41 = vmul.f32 %v122_v39, %v114_v34 }
  0xe7   :  { %v123_v42 = vmul.f32 %v121_v40, %v109_v36 }
  0xe8   :  { %v126_v43 = vadd.f32 %v124_v41, %v114_v34 }
  0xe9   :  { %v125_v44 = vadd.f32 %v123_v42, %v109_v36 }
  0xea   :  { %v128_v45 = vmul.f32 0.7978846, %v126_v43 }
  0xeb   :  { %v127_v46 = vmul.f32 0.7978846, %v125_v44 }
  0xec   :  { %405 = vtanh.f32 %v128_v45 }
  0xed   :  { %407 = vtanh.f32 %v127_v46 }
  0xf6   :  { %v406_v47 = vpop.eup %405 }
  0xf7   :  { %v408_v48 = vpop.eup %407  ;;  %v132_v49 = vadd.f32 1.0, %v406_v47 }
  0xf8   :  { %v131_v51 = vadd.f32 1.0, %v408_v48 }
  0xf9   :  { %v134_v54 = vmul.f32 %v132_v49, %v118_v52 }
  0xfa   :  { %v133_v53 = vmul.f32 %v131_v51, %v117_v50 }
  0xfc   :  { %359 = vmatprep.mubr.f32.mxu1 %v133_v53 }
  0xfd   :  { %360 = vmatmul.mubr.f32.vlgmr.msra.gmra.mrb[0].mxu1 %v134_v54 }
 0x1d0   :  { %v361_v56 = vpop.f32.mrb[0].mxu1 }
 0x1d1   :  { %v237_v57 = vadd.f32 %v361_v56, %v291_v55  ;;  %v217_v58 = vpop.f32.mrb[1].mxu1 }
 0x1d2   :  { %v236_v59 = vadd.f32 %v291_v55, %v217_v58 }
 0x1d3   :  { %239 = vst.msk [vmem:[#allocation3 + $0x8] sm:$0xff] %vm35_vm0, %v237_v57 }
 0x1d4   :  { %238 = vst.msk [vmem:[#allocation3] sm:$0xff] %vm35_vm0, %v236_v59 }
 0x1d5   :  { %420 = shalt.err (!%p417_p4)
}
 0x1d6   :  { %s421_s15 = scalar_lea.hbm %s559_s5, 256 }
 0x1d7   :  { %p422_p5 = scmp.ne.s32.totalorder %s559_s5, %s421_s15  ;;  %p425_p6 = scmp.lt.u32.totalorder %s421_s15, %s559_s5 }
 0x1d9   :  { %p427_p7 = pnand %p425_p6, %p422_p5 }
 0x1db   :  { %430 = shalt.err (!%p427_p7)
}
 0x1dc   :  { %s434_s19 = smov 128   ;;  %s435_s20 = smov 8  }
 0x1dd   :  { %283 = dma.vmem_to_hbm [thread:$0]  %s278_s12, 256, %s559_s5, [#allocation4], %s434_s19, %s434_s19, %s435_s20  }
 0x1de   :  { %431 = dma.done.wait [#allocation4], 256  }
 0x1df   :  { %432 = vsyncadd [#allocation4], 4294967040 }
 0x1e0   :  { %287 = vsyncpa [#allocation4], 1 }

</bundles_post_ra>
